<compile_context>
chip_gen: v6e
topology: v6e:2x2x1
jax: 0.10.0
libtpu: 0.0.40
codegen_flags: <defaults>
</compile_context>

<pallas_src>
import functools

import jax
import jax.numpy as jnp
from jax.experimental import pallas as pl
from jax.experimental.pallas import tpu as pltpu


def _patch_merge_kernel(x_ref, w_ref, g_ref, b_ref, o_ref, *, W2, K2, compute_dtype):
    # x_ref: (tile_r, 2, W2, 2C)  -- raw activation view (no pre-gather)
    # w_ref: (4C, dim_out)        -- rows permuted to [x0, x2, x1, x3]
    # g_ref, b_ref: (1, dim_out)  -- LayerNorm affine
    # o_ref: (tile_r*W2, dim_out)
    tile_r = x_ref.shape[0]
    tm = tile_r * W2
    dim_out = o_ref.shape[-1]

    xt = x_ref[...]
    # even-input-row slab carries [x0 | x2] channels, odd-row slab [x1 | x3].
    # TODO(synk): if W2 % 8 != 0 (Swin W2 in {28,14,7}) this (tile_r,W2)->tm
    # flatten may trigger a Mosaic relayout; audit the bundle dump and feed a
    # 3-D slab to lax.dot_general if it shows up on the critical path.
    slab_even = xt[:, 0].reshape(tm, K2).astype(compute_dtype)
    slab_odd = xt[:, 1].reshape(tm, K2).astype(compute_dtype)

    w = w_ref[...]
    y = jnp.dot(slab_even, w[:K2, :], preferred_element_type=jnp.float32)
    # TODO(synk): verify on v7x that this chains into an MRB in-place
    # accumulate instead of a second materialized (tm, dim_out) f32 + VPU add.
    y = y + jnp.dot(slab_odd, w[K2:, :], preferred_element_type=jnp.float32)

    # One-pass LayerNorm statistics in f32 (biased var, eps = 1e-5).
    inv_n = 1.0 / dim_out
    s1 = jnp.sum(y, axis=-1, keepdims=True)
    s2 = jnp.sum(y * y, axis=-1, keepdims=True)
    mean = s1 * inv_n
    var = jnp.maximum(s2 * inv_n - mean * mean, 0.0)
    y_norm = (y - mean) * jax.lax.rsqrt(var + 1e-5)
    o_ref[...] = (y_norm * g_ref[...] + b_ref[...]).astype(o_ref.dtype)


def _vmem_capacity_bytes():
    try:
        cap = int(pltpu.get_tpu_info().vmem_capacity_bytes)
        if cap > 0:
            return cap
    except Exception:
        pass
    return 64 * 1024 * 1024          # conservative default (v7x-sized)


def _pick_tile_r(R, W2, per_r_bytes, act_budget, target_out_rows=2048):
    """Pick tile_r (merged (b, h2) rows per grid step).

    Prefers lane/sublane-friendly output tiles (tile_m % 256, then %16 / %8),
    allows a non-divisor tile_r (grid = cdiv, masked partial last block), and
    keeps the grid >= 2 steps so both v7x TensorCores get work.
    """
    cap = min(R,
              max(1, target_out_rows // max(W2, 1)),
              max(1, act_budget // max(per_r_bytes, 1)))
    if R >= 2:
        cap = min(cap, (R + 1) // 2)   # guarantee at least 2 grid steps
    cap = max(cap, 1)

    def align_score(tr):
        tm = tr * W2
        if tm % 256 == 0:
            return 3
        if tm % 16 == 0:
            return 2
        if tm % 8 == 0:
            return 1
        return 0

    best, best_key = None, None
    for tr in range(1, cap + 1):
        # Mosaic block constraint: second-to-last output dim must be a
        # multiple of 8 unless the block covers the whole array.
        if (tr * W2) % 8 != 0 and tr != R:
            continue
        key = (align_score(tr), tr, 1 if R % tr == 0 else 0)
        if best_key is None or key > best_key:
            best_key, best = key, tr
    if best is None:
        best = R                       # single full-extent block (always legal)
    return best


def prepare_params(weight, gamma, beta, *, compute_dtype=jnp.bfloat16):
    """Hoisted (parameter-load-time) weight row permutation + dtype casts.

    weight: (4*C, dim_out), rows ordered for PyTorch's concat [x0, x1, x2, x3]
            (i.e. torch nn.Linear(4C, dim_out, bias=False).weight.T).
    """
    K, dim_out = weight.shape
    assert K % 4 == 0, weight.shape
    C = K // 4
    if compute_dtype is None:
        compute_dtype = weight.dtype
    # Permute weight rows once so the kernel's natural channel order
    # ([x0|x2] for even rows, [x1|x3] for odd rows) matches PyTorch's order.
    w_perm = (weight.reshape(4, C, dim_out)[jnp.array([0, 2, 1, 3])]
              .reshape(K, dim_out).astype(compute_dtype))
    gamma2 = gamma.reshape(1, dim_out).astype(jnp.float32)
    beta2 = beta.reshape(1, dim_out).astype(jnp.float32)
    return w_perm, gamma2, beta2


def patch_merging_prepared(x, x_size, w_perm, gamma2, beta2, *, compute_dtype=None):
    """PatchMerging forward with pre-permuted/cast parameters.

    x: (B, H*W, C) activations, row-major over (H, W).
    Returns (B, (H//2)*(W//2), dim_out) in x.dtype.
    """
    H, W = x_size
    B, L, C = x.shape
    assert L == H * W, "input feature has wrong size"
    assert H % 2 == 0 and W % 2 == 0, f"x size ({H}*{W}) are not even."
    K = 4 * C
    assert w_perm.shape[0] == K, (w_perm.shape, C)
    dim_out = w_perm.shape[1]
    if compute_dtype is None:
        compute_dtype = w_perm.dtype

    H2, W2 = H // 2, W // 2
    R = B * H2                 # merged-row count (grid axis)
    M = R * W2                 # output rows
    K2 = 2 * C

    # Zero-copy view: (B, H*W, C) == (B, H/2, 2, W/2, 2, C) -> (B*H/2, 2, W/2, 2C).
    # Column-parity pairs are contiguous with the channels, so no HBM
    # gather/concat pass is needed — the kernel DMAs x directly.
    x_r = x.reshape(R, 2, W2, K2)

    # ---- generation-aware VMEM budget ----
    x_bytes = jnp.dtype(x.dtype).itemsize
    o_bytes = jnp.dtype(x.dtype).itemsize
    w_bytes = jnp.dtype(compute_dtype).itemsize
    physical_vmem = _vmem_capacity_bytes()
    vmem_limit = max(32 * 1024 * 1024, (physical_vmem * 3) // 4)   # ~96 MiB on 128 MiB parts, ~48 MiB on v7x
    vmem_limit = min(vmem_limit, physical_vmem - 8 * 1024 * 1024)

    weight_resident = K * dim_out * w_bytes + 2 * dim_out * 4      # single-buffered weight + affine
    act_budget = max(4 * 1024 * 1024,
                     vmem_limit - weight_resident - 8 * 1024 * 1024)
    per_r = (2 * (2 * W2 * K2 * x_bytes)       # double-buffered input block
             + 2 * (W2 * dim_out * o_bytes)    # double-buffered output block
             + W2 * dim_out * 4                # f32 matmul result / LN temps
             + 2 * (W2 * K2 * w_bytes))        # cast slabs
    tile_r = _pick_tile_r(R, W2, per_r, act_budget)
    tile_m = tile_r * W2
    grid = pl.cdiv(R, tile_r)                  # non-divisor tile_r allowed

    kernel = functools.partial(_patch_merge_kernel, W2=W2, K2=K2,
                               compute_dtype=compute_dtype)
    cost = pl.CostEstimate(
        flops=2 * M * K * dim_out,
        transcendentals=M,
        bytes_accessed=(R * 2 * W2 * K2 * x_bytes
                        + K * dim_out * w_bytes
                        + M * dim_out * o_bytes),
    )

    def run(const_pipeline_mode):
        const_kw = ({} if const_pipeline_mode is None
                    else {"pipeline_mode": const_pipeline_mode})
        return pl.pallas_call(
            kernel,
            out_shape=jax.ShapeDtypeStruct((M, dim_out), x.dtype),
            grid_spec=pltpu.PrefetchScalarGridSpec(
                num_scalar_prefetch=0,
                grid=(grid,),
                in_specs=[
                    pl.BlockSpec((tile_r, 2, W2, K2), lambda i: (i, 0, 0, 0)),
                    pl.BlockSpec((K, dim_out), lambda i: (0, 0), **const_kw),
                    pl.BlockSpec((1, dim_out), lambda i: (0, 0), **const_kw),
                    pl.BlockSpec((1, dim_out), lambda i: (0, 0), **const_kw),
                ],
                out_specs=pl.BlockSpec((tile_m, dim_out), lambda i: (i, 0)),
            ),
            compiler_params=pltpu.CompilerParams(
                dimension_semantics=("parallel",),
                vmem_limit_bytes=vmem_limit,
            ),
            cost_estimate=cost,
        )(x_r, w_perm, gamma2, beta2)

    try:
        # Weight / affine params have a constant index_map -> single-buffer
        # them so the saved VMEM flows into a larger activation tile.
        out = run(pl.Buffered(1))
    except Exception:
        out = run(None)

    return out.reshape(B, H2 * W2, dim_out)


def patch_merging(x, x_size, weight, gamma, beta, *, compute_dtype=jnp.bfloat16):
    """Convenience wrapper (permutes/casts params every call).  Prefer
    prepare_params() once + patch_merging_prepared() inside a real model."""
    w_perm, gamma2, beta2 = prepare_params(weight, gamma, beta,
                                           compute_dtype=compute_dtype)
    return patch_merging_prepared(x, x_size, w_perm, gamma2, beta2,
                                  compute_dtype=compute_dtype)


def reference(x, x_size, weight, gamma, beta):
    """Pure-JAX f32 reference matching the PyTorch module exactly."""
    H, W = x_size
    B, L, C = x.shape
    xh = x.astype(jnp.float32).reshape(B, H, W, C)
    x0 = xh[:, 0::2, 0::2, :]
    x1 = xh[:, 1::2, 0::2, :]
    x2 = xh[:, 0::2, 1::2, :]
    x3 = xh[:, 1::2, 1::2, :]
    xm = jnp.concatenate([x0, x1, x2, x3], axis=-1).reshape(B, -1, 4 * C)
    y = xm @ weight.astype(jnp.float32)
    mean = jnp.mean(y, axis=-1, keepdims=True)
    var = jnp.mean((y - mean) ** 2, axis=-1, keepdims=True)
    return (y - mean) / jnp.sqrt(var + 1e-5) * gamma + beta


if __name__ == "__main__":
    # ---- small demo shapes consistent with the module ----
    B, C, H, W = 2, 4, 16, 16
    dim_out = 8

    key = jax.random.PRNGKey(0)
    kx, kw, kg, kb = jax.random.split(key, 4)
    x = jax.random.normal(kx, (B, H * W, C), dtype=jnp.float32)
    # nn.Linear(4*dim_in, dim_out, bias=False) stores (dim_out, 4*dim_in);
    # we keep it transposed so y = x_merged @ weight.
    weight = jax.random.normal(kw, (4 * C, dim_out), dtype=jnp.float32) * 0.1
    gamma = 1.0 + 0.1 * jax.random.normal(kg, (dim_out,), dtype=jnp.float32)
    beta = 0.1 * jax.random.normal(kb, (dim_out,), dtype=jnp.float32)

    ref = reference(x, (H, W), weight, gamma, beta)

    # (1) Exact f32 path (params prepared once -> hoisted permute/casts).
    w32, g32, b32 = prepare_params(weight, gamma, beta, compute_dtype=jnp.float32)
    out_f32 = jax.block_until_ready(patch_merging_prepared(x, (H, W), w32, g32, b32))
    assert out_f32.shape == (B, (H // 2) * (W // 2), dim_out), out_f32.shape
    assert jnp.allclose(out_f32, ref, atol=2e-4, rtol=2e-4), \
        float(jnp.max(jnp.abs(out_f32 - ref)))

    # (2) Default bf16-matmul path (f32 accumulation / f32 LayerNorm).
    out_bf16 = jax.block_until_ready(patch_merging(x, (H, W), weight, gamma, beta))
    assert out_bf16.shape == (B, (H // 2) * (W // 2), dim_out), out_bf16.shape
    assert jnp.allclose(out_bf16, ref, atol=5e-2, rtol=5e-2), \
        float(jnp.max(jnp.abs(out_bf16 - ref)))

    # (3) bf16 activations in HBM (the mem-bound configuration this kernel is
    #     tuned for): halves the dominant HBM read bytes.
    x_bf16 = x.astype(jnp.bfloat16)
    out_bf16_act = jax.block_until_ready(
        patch_merging(x_bf16, (H, W), weight, gamma, beta))
    assert out_bf16_act.shape == (B, (H // 2) * (W // 2), dim_out)
    assert jnp.allclose(out_bf16_act.astype(jnp.float32), ref,
                        atol=2.5e-1, rtol=1e-1), \
        float(jnp.max(jnp.abs(out_bf16_act.astype(jnp.float32) - ref)))

    # (4) Shape that forces a non-divisor tile (partial last block -> masked
    #     output writes): validates the cdiv-grid path against the reference.
    B2, H2s, W2s = 3, 20, 16
    x2 = jax.random.normal(jax.random.PRNGKey(1), (B2, H2s * W2s, C),
                           dtype=jnp.float32)
    ref2 = reference(x2, (H2s, W2s), weight, gamma, beta)
    out2 = jax.block_until_ready(
        patch_merging_prepared(x2, (H2s, W2s), w32, g32, b32))
    assert out2.shape == (B2, (H2s // 2) * (W2s // 2), dim_out), out2.shape
    assert jnp.allclose(out2, ref2, atol=2e-4, rtol=2e-4), \
        float(jnp.max(jnp.abs(out2 - ref2)))

    print("KERNEL_OK")
</pallas_src>

<mosaic_0001>
module attributes {stable_mosaic.version = 11 : i64} {
  func.func @_patch_merge_kernel(%arg0: i32, %arg1: memref<8x2x8x8xf32, #tpu.memory_space<vmem>>, %arg2: memref<16x8xf32, #tpu.memory_space<vmem>>, %arg3: memref<1x8xf32, #tpu.memory_space<vmem>>, %arg4: memref<1x8xf32, #tpu.memory_space<vmem>>, %arg5: memref<64x8xf32, #tpu.memory_space<vmem>>) attributes {dimension_semantics = [#tpu.dimension_semantics<parallel>], iteration_bounds = array<i64: 2>, scalar_prefetch = 0 : i64, scratch_operands = 0 : i64, tpu.core_type = #tpu.core_type<tc>, window_params = [{transform_indices = @transform_0, window_bounds = array<i64: 8, 2, 8, 8>}, {pipeline_mode = #tpu.pipeline_mode<synchronous>, transform_indices = @transform_1, window_bounds = array<i64: 16, 8>}, {pipeline_mode = #tpu.pipeline_mode<synchronous>, transform_indices = @transform_2, window_bounds = array<i64: 1, 8>}, {pipeline_mode = #tpu.pipeline_mode<synchronous>, transform_indices = @transform_3, window_bounds = array<i64: 1, 8>}, {transform_indices = @transform_4, window_bounds = array<i64: 64, 8>}]} {
    %c0 = arith.constant 0 : index
    %c0_0 = arith.constant 0 : index
    %c0_1 = arith.constant 0 : index
    %c0_2 = arith.constant 0 : index
    %0 = vector.load %arg1[%c0, %c0_0, %c0_1, %c0_2] : memref<8x2x8x8xf32, #tpu.memory_space<vmem>>, vector<8x2x8x8xf32>
    %1 = vector.extract_strided_slice %0 {offsets = [0, 0, 0, 0], sizes = [8, 1, 8, 8], strides = [1, 1, 1, 1]} : vector<8x2x8x8xf32> to vector<8x1x8x8xf32>
    %2 = vector.shape_cast %1 : vector<8x1x8x8xf32> to vector<8x8x8xf32>
    %3 = vector.shape_cast %2 : vector<8x8x8xf32> to vector<64x8xf32>
    %4 = vector.extract_strided_slice %0 {offsets = [0, 1, 0, 0], sizes = [8, 1, 8, 8], strides = [1, 1, 1, 1]} : vector<8x2x8x8xf32> to vector<8x1x8x8xf32>
    %5 = vector.shape_cast %4 : vector<8x1x8x8xf32> to vector<8x8x8xf32>
    %6 = vector.shape_cast %5 : vector<8x8x8xf32> to vector<64x8xf32>
    %c0_3 = arith.constant 0 : index
    %c0_4 = arith.constant 0 : index
    %7 = vector.load %arg2[%c0_3, %c0_4] : memref<16x8xf32, #tpu.memory_space<vmem>>, vector<16x8xf32>
    %8 = vector.extract_strided_slice %7 {offsets = [0, 0], sizes = [8, 8], strides = [1, 1]} : vector<16x8xf32> to vector<8x8xf32>
    %cst = arith.constant dense<0.000000e+00> : vector<64x8xf32>
    %9 = tpu.matmul %3, %8, %cst {dimension_numbers = #tpu.dot_dimension_numbers<[1], [0], [0], [1], [0, 0, 1, 1], [], []>} : vector<64x8xf32>, vector<8x8xf32>, vector<64x8xf32> -> vector<64x8xf32>
    %10 = vector.extract_strided_slice %7 {offsets = [8, 0], sizes = [8, 8], strides = [1, 1]} : vector<16x8xf32> to vector<8x8xf32>
    %cst_5 = arith.constant dense<0.000000e+00> : vector<64x8xf32>
    %11 = tpu.matmul %6, %10, %cst_5 {dimension_numbers = #tpu.dot_dimension_numbers<[1], [0], [0], [1], [0, 0, 1, 1], [], []>} : vector<64x8xf32>, vector<8x8xf32>, vector<64x8xf32> -> vector<64x8xf32>
    %12 = arith.addf %9, %11 : vector<64x8xf32>
    %cst_6 = arith.constant dense<0.000000e+00> : vector<64xf32>
    %13 = vector.multi_reduction <add>, %12, %cst_6 [1] : vector<64x8xf32> to vector<64xf32>
    %14 = vector.shape_cast %13 : vector<64xf32> to vector<64x1xf32>
    %15 = arith.mulf %12, %12 : vector<64x8xf32>
    %cst_7 = arith.constant dense<0.000000e+00> : vector<64xf32>
    %16 = vector.multi_reduction <add>, %15, %cst_7 [1] : vector<64x8xf32> to vector<64xf32>
    %17 = vector.shape_cast %16 : vector<64xf32> to vector<64x1xf32>
    %cst_8 = arith.constant 1.250000e-01 : f32
    %18 = vector.broadcast %cst_8 : f32 to vector<64x1xf32>
    %19 = arith.mulf %14, %18 : vector<64x1xf32>
    %cst_9 = arith.constant 1.250000e-01 : f32
    %20 = vector.broadcast %cst_9 : f32 to vector<64x1xf32>
    %21 = arith.mulf %17, %20 : vector<64x1xf32>
    %22 = arith.mulf %19, %19 : vector<64x1xf32>
    %23 = arith.subf %21, %22 : vector<64x1xf32>
    %cst_10 = arith.constant 0.000000e+00 : f32
    %24 = vector.broadcast %cst_10 : f32 to vector<64x1xf32>
    %25 = arith.maximumf %23, %24 : vector<64x1xf32>
    %26 = vector.broadcast %19 : vector<64x1xf32> to vector<64x8xf32>
    %27 = arith.subf %12, %26 : vector<64x8xf32>
    %cst_11 = arith.constant 9.99999974E-6 : f32
    %28 = vector.broadcast %cst_11 : f32 to vector<64x1xf32>
    %29 = arith.addf %25, %28 : vector<64x1xf32>
    %30 = math.rsqrt %29 : vector<64x1xf32>
    %31 = vector.broadcast %30 : vector<64x1xf32> to vector<64x8xf32>
    %32 = arith.mulf %27, %31 : vector<64x8xf32>
    %c0_12 = arith.constant 0 : index
    %c0_13 = arith.constant 0 : index
    %33 = vector.load %arg3[%c0_12, %c0_13] : memref<1x8xf32, #tpu.memory_space<vmem>>, vector<1x8xf32>
    %34 = vector.broadcast %33 : vector<1x8xf32> to vector<64x8xf32>
    %35 = arith.mulf %32, %34 : vector<64x8xf32>
    %c0_14 = arith.constant 0 : index
    %c0_15 = arith.constant 0 : index
    %36 = vector.load %arg4[%c0_14, %c0_15] : memref<1x8xf32, #tpu.memory_space<vmem>>, vector<1x8xf32>
    %37 = vector.broadcast %36 : vector<1x8xf32> to vector<64x8xf32>
    %38 = arith.addf %35, %37 : vector<64x8xf32>
    %c0_16 = arith.constant 0 : index
    %c0_17 = arith.constant 0 : index
    %39 = vector.load %arg5[%c0_16, %c0_17] : memref<64x8xf32, #tpu.memory_space<vmem>>, vector<64x8xf32>
    tpu.vector_store %arg5[%c0_16, %c0_17], %38 {strides = array<i32>} : memref<64x8xf32, #tpu.memory_space<vmem>>, vector<64x8xf32>,
    return
  }
  func.func @transform_0(%arg0: i32) -> (i32, i32, i32, i32) {
    %c0_i32 = arith.constant 0 : i32
    %c0_i32_0 = arith.constant 0 : i32
    %c0_i32_1 = arith.constant 0 : i32
    %c0_i32_2 = arith.constant 0 : i32
    return %arg0, %c0_i32, %c0_i32_0, %c0_i32_1 : i32, i32, i32, i32
  }
  func.func @transform_1(%arg0: i32) -> (i32, i32) {
    %c0_i32 = arith.constant 0 : i32
    %c0_i32_0 = arith.constant 0 : i32
    %c0_i32_1 = arith.constant 0 : i32
    return %c0_i32, %c0_i32_0 : i32, i32
  }
  func.func @transform_2(%arg0: i32) -> (i32, i32) {
    %c0_i32 = arith.constant 0 : i32
    %c0_i32_0 = arith.constant 0 : i32
    %c0_i32_1 = arith.constant 0 : i32
    return %c0_i32, %c0_i32_0 : i32, i32
  }
  func.func @transform_3(%arg0: i32) -> (i32, i32) {
    %c0_i32 = arith.constant 0 : i32
    %c0_i32_0 = arith.constant 0 : i32
    %c0_i32_1 = arith.constant 0 : i32
    return %c0_i32, %c0_i32_0 : i32, i32
  }
  func.func @transform_4(%arg0: i32) -> (i32, i32) {
    %c0_i32 = arith.constant 0 : i32
    %c0_i32_0 = arith.constant 0 : i32
    return %arg0, %c0_i32 : i32, i32
  }
}

module attributes {stable_mosaic.version = 11 : i64} {
  func.func @_patch_merge_kernel(%arg0: i32, %arg1: memref<8x2x8x8xf32, #tpu.memory_space<vmem>>, %arg2: memref<16x8xf32, #tpu.memory_space<vmem>>, %arg3: memref<1x8xf32, #tpu.memory_space<vmem>>, %arg4: memref<1x8xf32, #tpu.memory_space<vmem>>, %arg5: memref<64x8xf32, #tpu.memory_space<vmem>>) attributes {dimension_semantics = [#tpu.dimension_semantics<parallel>], iteration_bounds = array<i64: 2>, scalar_prefetch = 0 : i64, scratch_operands = 0 : i64, tpu.core_type = #tpu.core_type<tc>, window_params = [{transform_indices = @transform_0, window_bounds = array<i64: 8, 2, 8, 8>}, {pipeline_mode = #tpu.pipeline_mode<synchronous>, transform_indices = @transform_1, window_bounds = array<i64: 16, 8>}, {pipeline_mode = #tpu.pipeline_mode<synchronous>, transform_indices = @transform_2, window_bounds = array<i64: 1, 8>}, {pipeline_mode = #tpu.pipeline_mode<synchronous>, transform_indices = @transform_3, window_bounds = array<i64: 1, 8>}, {transform_indices = @transform_4, window_bounds = array<i64: 64, 8>}]} {
    %c0 = arith.constant 0 : index
    %c0_0 = arith.constant 0 : index
    %c0_1 = arith.constant 0 : index
    %c0_2 = arith.constant 0 : index
    %0 = vector.load %arg1[%c0, %c0_0, %c0_1, %c0_2] : memref<8x2x8x8xf32, #tpu.memory_space<vmem>>, vector<8x2x8x8xf32>
    %1 = vector.extract_strided_slice %0 {offsets = [0, 0, 0, 0], sizes = [8, 1, 8, 8], strides = [1, 1, 1, 1]} : vector<8x2x8x8xf32> to vector<8x1x8x8xf32>
    %2 = vector.shape_cast %1 : vector<8x1x8x8xf32> to vector<8x8x8xf32>
    %3 = vector.shape_cast %2 : vector<8x8x8xf32> to vector<64x8xf32>
    %4 = vector.extract_strided_slice %0 {offsets = [0, 1, 0, 0], sizes = [8, 1, 8, 8], strides = [1, 1, 1, 1]} : vector<8x2x8x8xf32> to vector<8x1x8x8xf32>
    %5 = vector.shape_cast %4 : vector<8x1x8x8xf32> to vector<8x8x8xf32>
    %6 = vector.shape_cast %5 : vector<8x8x8xf32> to vector<64x8xf32>
    %c0_3 = arith.constant 0 : index
    %c0_4 = arith.constant 0 : index
    %7 = vector.load %arg2[%c0_3, %c0_4] : memref<16x8xf32, #tpu.memory_space<vmem>>, vector<16x8xf32>
    %8 = vector.extract_strided_slice %7 {offsets = [0, 0], sizes = [8, 8], strides = [1, 1]} : vector<16x8xf32> to vector<8x8xf32>
    %cst = arith.constant dense<0.000000e+00> : vector<64x8xf32>
    %9 = tpu.matmul %3, %8, %cst {dimension_numbers = #tpu.dot_dimension_numbers<[1], [0], [0], [1], [0, 0, 1, 1], [], []>} : vector<64x8xf32>, vector<8x8xf32>, vector<64x8xf32> -> vector<64x8xf32>
    %10 = vector.extract_strided_slice %7 {offsets = [8, 0], sizes = [8, 8], strides = [1, 1]} : vector<16x8xf32> to vector<8x8xf32>
    %cst_5 = arith.constant dense<0.000000e+00> : vector<64x8xf32>
    %11 = tpu.matmul %6, %10, %cst_5 {dimension_numbers = #tpu.dot_dimension_numbers<[1], [0], [0], [1], [0, 0, 1, 1], [], []>} : vector<64x8xf32>, vector<8x8xf32>, vector<64x8xf32> -> vector<64x8xf32>
    %12 = arith.addf %9, %11 : vector<64x8xf32>
    %cst_6 = arith.constant dense<0.000000e+00> : vector<64xf32>
    %13 = vector.multi_reduction <add>, %12, %cst_6 [1] : vector<64x8xf32> to vector<64xf32>
    %14 = vector.shape_cast %13 : vector<64xf32> to vector<64x1xf32>
    %15 = arith.mulf %12, %12 : vector<64x8xf32>
    %cst_7 = arith.constant dense<0.000000e+00> : vector<64xf32>
    %16 = vector.multi_reduction <add>, %15, %cst_7 [1] : vector<64x8xf32> to vector<64xf32>
    %17 = vector.shape_cast %16 : vector<64xf32> to vector<64x1xf32>
    %cst_8 = arith.constant 1.250000e-01 : f32
    %18 = vector.broadcast %cst_8 : f32 to vector<64x1xf32>
    %19 = arith.mulf %14, %18 : vector<64x1xf32>
    %cst_9 = arith.constant 1.250000e-01 : f32
    %20 = vector.broadcast %cst_9 : f32 to vector<64x1xf32>
    %21 = arith.mulf %17, %20 : vector<64x1xf32>
    %22 = arith.mulf %19, %19 : vector<64x1xf32>
    %23 = arith.subf %21, %22 : vector<64x1xf32>
    %cst_10 = arith.constant 0.000000e+00 : f32
    %24 = vector.broadcast %cst_10 : f32 to vector<64x1xf32>
    %25 = arith.maximumf %23, %24 : vector<64x1xf32>
    %26 = vector.broadcast %19 : vector<64x1xf32> to vector<64x8xf32>
    %27 = arith.subf %12, %26 : vector<64x8xf32>
    %cst_11 = arith.constant 9.99999974E-6 : f32
    %28 = vector.broadcast %cst_11 : f32 to vector<64x1xf32>
    %29 = arith.addf %25, %28 : vector<64x1xf32>
    %30 = math.rsqrt %29 : vector<64x1xf32>
    %31 = vector.broadcast %30 : vector<64x1xf32> to vector<64x8xf32>
    %32 = arith.mulf %27, %31 : vector<64x8xf32>
    %c0_12 = arith.constant 0 : index
    %c0_13 = arith.constant 0 : index
    %33 = vector.load %arg3[%c0_12, %c0_13] : memref<1x8xf32, #tpu.memory_space<vmem>>, vector<1x8xf32>
    %34 = vector.broadcast %33 : vector<1x8xf32> to vector<64x8xf32>
    %35 = arith.mulf %32, %34 : vector<64x8xf32>
    %c0_14 = arith.constant 0 : index
    %c0_15 = arith.constant 0 : index
    %36 = vector.load %arg4[%c0_14, %c0_15] : memref<1x8xf32, #tpu.memory_space<vmem>>, vector<1x8xf32>
    %37 = vector.broadcast %36 : vector<1x8xf32> to vector<64x8xf32>
    %38 = arith.addf %35, %37 : vector<64x8xf32>
    %c0_16 = arith.constant 0 : index
    %c0_17 = arith.constant 0 : index
    %39 = vector.load %arg5[%c0_16, %c0_17] : memref<64x8xf32, #tpu.memory_space<vmem>>, vector<64x8xf32>
    tpu.vector_store %arg5[%c0_16, %c0_17], %38 {strides = array<i32>} : memref<64x8xf32, #tpu.memory_space<vmem>>, vector<64x8xf32>,
    return
  }
  func.func @transform_0(%arg0: i32) -> (i32, i32, i32, i32) {
    %c0_i32 = arith.constant 0 : i32
    %c0_i32_0 = arith.constant 0 : i32
    %c0_i32_1 = arith.constant 0 : i32
    %c0_i32_2 = arith.constant 0 : i32
    return %arg0, %c0_i32, %c0_i32_0, %c0_i32_1 : i32, i32, i32, i32
  }
  func.func @transform_1(%arg0: i32) -> (i32, i32) {
    %c0_i32 = arith.constant 0 : i32
    %c0_i32_0 = arith.constant 0 : i32
    %c0_i32_1 = arith.constant 0 : i32
    return %c0_i32, %c0_i32_0 : i32, i32
  }
  func.func @transform_2(%arg0: i32) -> (i32, i32) {
    %c0_i32 = arith.constant 0 : i32
    %c0_i32_0 = arith.constant 0 : i32
    %c0_i32_1 = arith.constant 0 : i32
    return %c0_i32, %c0_i32_0 : i32, i32
  }
  func.func @transform_3(%arg0: i32) -> (i32, i32) {
    %c0_i32 = arith.constant 0 : i32
    %c0_i32_0 = arith.constant 0 : i32
    %c0_i32_1 = arith.constant 0 : i32
    return %c0_i32, %c0_i32_0 : i32, i32
  }
  func.func @transform_4(%arg0: i32) -> (i32, i32) {
    %c0_i32 = arith.constant 0 : i32
    %c0_i32_0 = arith.constant 0 : i32
    return %arg0, %c0_i32 : i32, i32
  }
}

</mosaic_0001>

<bundles_post_ra>
// kernel: tpu_custom_call.1
= control target key start
LH: loop header
LB: loop body
LE: loop exit
PB: predicated region body
PF: predicated region fallthrough
CT: control target
= control target key end

     0   :  { %s837_s15 = smov 0   ;;  %s1013_s0 = inlined_call_operand.vmem [shape: f32[16,2,8,8], index: 0, kind: input, shape index: {}]   ;;  %s1014_s1 = inlined_call_operand.vmem [shape: f32[16,8], index: 1, kind: input, shape index: {}]   ;;  %s1015_s2 = inlined_call_operand.vmem [shape: f32[1,8], index: 2, kind: input, shape index: {}]   ;;  %s1016_s3 = inlined_call_operand.vmem [shape: f32[1,8], index: 3, kind: input, shape index: {}]   ;;  %s1017_s4 = inlined_call_operand.vmem [shape: f32[128,8], index: 4, kind: output, shape index: {}]  }
   0x1 LB: > { %s703_s16 = sadd.s32 4294967295, %s810_s15   ;;  %p707_p0 = scmp.ge.s32.totalorder %s810_s15, 1  ;;  %s810_s15 = sphi %s837_s15, %s14_s15  }
   0x2   : > { %p164_p1 = scmp.lt.s32.totalorder %s810_s15, 3 }
   0x4   : > { %p165_p2 = pnand %p707_p0, %p164_p1 }
   0x5   : > { %s708_s21 = sshll.u32 (!%p165_p2), %s703_s16, 3 }
   0x6   : > { %168 = sbr.rel (%p165_p2) target bundleno = 409 (0x199), region = 36  ;;  %p192_p3 = scmp.lt.s32.totalorder (!%p165_p2), %s708_s21, 15 }
   0xb   : > { %v221_v0 = vld [vmem:[%s1014_s1 + $0x8] sm:$0xff]  ;;  %v220_v1 = vld [vmem:[%s1014_s1] sm:$0xff]  ;;  %s1019_s21 = smov (!%p192_p3, %s708_s21), 15  ;;  %vm222_vm0 = vcmask 64512  }
   0xc   : > { %752 = vmatprep.subr.mxu0 %v221_v0  ;;  %766 = vmatprep.subr.mxu1 %v220_v1  ;;  %s733_s22 = sshll.u32 %s1019_s21, 4  ;;  %s712_s28 = sshll.u32 %s1019_s21, 3 }
   0xd   : > { %753 = vmatpush3.msra.mxu0 %v221_v0  ;;  %767 = vmatpush3.msra.mxu1 %v220_v1  ;;  %s196_s25 = scalar_lea.vmem %s1013_s0, %s733_s22  ;;  %s965_s7 = scalar_lea.vmem %s1017_s4, %s712_s28 }
   0xe   : > { %v205_v2 = vld [vmem:[%s196_s25 + $0x8] sm:$0xff]  ;;  %v204_v3 = vld [vmem:[%s196_s25] sm:$0xff]  ;;  %v207_v4 = vld [vmem:[%s196_s25 + $0x18] sm:$0xff] }
   0xf   : > { %754 = vmatprep.mubr.msk.f32.mxu0 %vm222_vm0, %v205_v2  ;;  %768 = vmatprep.mubr.msk.f32.mxu1 %vm222_vm0, %v204_v3  ;;  %v206_v5 = vld [vmem:[%s196_s25 + $0x10] sm:$0xff]  ;;  %v209_v6 = vld [vmem:[%s196_s25 + $0x28] sm:$0xff]  ;;  %v208_v7 = vld [vmem:[%s196_s25 + $0x20] sm:$0xff] }
  0x10   : > { %755 = vmatmul.mubr.msk.f32.vlgmr.msra.gmra.mxu0 %vm222_vm0, %v207_v4  ;;  %769 = vmatmul.mubr.msk.f32.vlgmr.msra.gmra.mxu1 %vm222_vm0, %v206_v5  ;;  %v211_v8 = vld [vmem:[%s196_s25 + $0x38] sm:$0xff]  ;;  %v210_v9 = vld [vmem:[%s196_s25 + $0x30] sm:$0xff]  ;;  %v213_v10 = vld [vmem:[%s196_s25 + $0x48] sm:$0xff] }
  0x11   : > { %757 = vmatprep.mubr.msk.f32.mxu0 %vm222_vm0, %v209_v6  ;;  %771 = vmatprep.mubr.msk.f32.mxu1 %vm222_vm0, %v208_v7  ;;  %v212_v11 = vld [vmem:[%s196_s25 + $0x40] sm:$0xff]  ;;  %v215_v12 = vld [vmem:[%s196_s25 + $0x58] sm:$0xff]  ;;  %v214_v13 = vld [vmem:[%s196_s25 + $0x50] sm:$0xff] }
  0x12   : > { %v217_v14 = vld [vmem:[%s196_s25 + $0x68] sm:$0xff]  ;;  %v216_v15 = vld [vmem:[%s196_s25 + $0x60] sm:$0xff]  ;;  %v219_v16 = vld [vmem:[%s196_s25 + $0x78] sm:$0xff] }
  0x13   : > { %v218_v17 = vld [vmem:[%s196_s25 + $0x70] sm:$0xff] }
  0x14   : > { %758 = vmatmul.mubr.msk.f32.gmra.mxu0 %vm222_vm0, %v211_v8  ;;  %772 = vmatmul.mubr.msk.f32.gmra.mxu1 %vm222_vm0, %v210_v9 }
  0x15   : > { %760 = vmatprep.mubr.msk.f32.mxu0 %vm222_vm0, %v213_v10  ;;  %774 = vmatprep.mubr.msk.f32.mxu1 %vm222_vm0, %v212_v11 }
  0x18   : > { %761 = vmatmul.mubr.msk.f32.gmra.mxu0 %vm222_vm0, %v215_v12  ;;  %775 = vmatmul.mubr.msk.f32.gmra.mxu1 %vm222_vm0, %v214_v13 }
  0x19   : > { %763 = vmatprep.mubr.msk.f32.mxu0 %vm222_vm0, %v217_v14  ;;  %777 = vmatprep.mubr.msk.f32.mxu1 %vm222_vm0, %v216_v15 }
  0x1c   : > { %764 = vmatmul.mubr.msk.f32.gmra.mxu0 %vm222_vm0, %v219_v16  ;;  %778 = vmatmul.mubr.msk.f32.gmra.mxu1 %vm222_vm0, %v218_v17 }
  0xd0   : > { %v756_v18 = vpop.f32.mrf.mxu0  ;;  %v770_v19 = vpop.f32.mrf.mxu1 }
  0xd1   : > { %v873_v20 = vadd.f32 %v770_v19, %v756_v18 }
  0xd2   : > { %v313_v21 = vpop.f32.mrf.mxu0  ;;  %v442_v22 = vpop.f32.mrf.mxu1 }
  0xd3   : > { %v875_v23 = vadd.f32 %v442_v22, %v313_v21  ;;  %v484_v24 = vsel %vm222_vm0, %v873_v20, 0.0  ;;  %v506_v25 = vmul.f32 %v873_v20, %v873_v20 }
  0xd4   : > { %v759_v26 = vpop.f32.mrf.mxu0  ;;  %485 = vadd.xlane.f32.xlu0 %v484_v24  ;;  %v773_v27 = vpop.f32.mrf.mxu1 }
  0xd5   : > { %v881_v28 = vadd.f32 %v773_v27, %v759_v26  ;;  %v516_v29 = vsel %vm222_vm0, %v506_v25, 0.0  ;;  %v481_v33 = vsel %vm222_vm0, %v875_v23, 0.0  ;;  %v505_v35 = vmul.f32 %v875_v23, %v875_v23 }
  0xd6   : > { %v323_v30 = vpop.f32.mrf.mxu0  ;;  %517 = vadd.xlane.f32.xlu1 %v516_v29  ;;  %v452_v31 = vpop.f32.mrf.mxu1 }
  0xd7   : > { %v884_v32 = vadd.f32 %v452_v31, %v323_v30  ;;  %v490_v34 = vsel %vm222_vm0, %v881_v28, 0.0  ;;  %v513_v40 = vsel %vm222_vm0, %v505_v35, 0.0  ;;  %v508_v44 = vmul.f32 %v881_v28, %v881_v28 }
  0xd8   : > { %482 = vadd.xlane.f32.xlu0 %v481_v33  ;;  %v762_v36 = vpop.f32.mrf.mxu0  ;;  %v776_v37 = vpop.f32.mrf.mxu1 }
  0xd9   : > { %v507_v41 = vmul.f32 %v884_v32, %v884_v32  ;;  %v487_v42 = vsel %vm222_vm0, %v884_v32, 0.0  ;;  %v902_v48 = vadd.f32 %v776_v37, %v762_v36  ;;  %v522_v49 = vsel %vm222_vm0, %v508_v44, 0.0 }
  0xda   : > { %491 = vadd.xlane.f32.xlu1 %v490_v34  ;;  %v333_v38 = vpop.f32.mrf.mxu0  ;;  %v462_v39 = vpop.f32.mrf.mxu1 }
  0xdb   : > { %v897_v43 = vadd.f32 %v462_v39, %v333_v38  ;;  %v519_v47 = vsel %vm222_vm0, %v507_v41, 0.0  ;;  %v496_v54 = vsel %vm222_vm0, %v902_v48, 0.0  ;;  %v510_v56 = vmul.f32 %v902_v48, %v902_v48 }
  0xdc   : > { %514 = vadd.xlane.f32.xlu0 %v513_v40  ;;  %v765_v45 = vpop.f32.mrf.mxu0  ;;  %v779_v46 = vpop.f32.mrf.mxu1 }
  0xdd   : > { %v493_v50 = vsel %vm222_vm0, %v897_v43, 0.0  ;;  %v509_v53 = vmul.f32 %v897_v43, %v897_v43  ;;  %v916_v58 = vadd.f32 %v779_v46, %v765_v45  ;;  %v528_v59 = vsel %vm222_vm0, %v510_v56, 0.0 }
  0xde   : > { %488 = vadd.xlane.f32.xlu1 %v487_v42  ;;  %v343_v51 = vpop.f32.mrf.mxu0  ;;  %v472_v52 = vpop.f32.mrf.mxu1 }
  0xdf   : > { %v911_v55 = vadd.f32 %v472_v52, %v343_v51  ;;  %v525_v57 = vsel %vm222_vm0, %v509_v53, 0.0  ;;  %v502_v62 = vsel %vm222_vm0, %v916_v58, 0.0  ;;  %v512_v63 = vmul.f32 %v916_v58, %v916_v58  ;;  %v953_v53 = vld [vmem:[%s1015_s2] ss:$0 sm:$0xff] }
  0xe0   : > { %520 = vadd.xlane.f32.xlu0 %v519_v47 }
  0xe1   : > { %v499_v60 = vsel %vm222_vm0, %v911_v55, 0.0  ;;  %v511_v61 = vmul.f32 %v911_v55, %v911_v55  ;;  %v534_v1 = vsel %vm222_vm0, %v512_v63, 0.0 }
  0xe2   : > { %523 = vadd.xlane.f32.xlu1 %v522_v49 }
  0xe3   : > { %v531_v0 = vsel %vm222_vm0, %v511_v61, 0.0 }
  0xe4   : > { %494 = vadd.xlane.f32.xlu0 %v493_v50 }
  0xe6   : > { %497 = vadd.xlane.f32.xlu1 %v496_v54 }
  0xe8   : > { %526 = vadd.xlane.f32.xlu0 %v525_v57 }
  0xea   : > { %529 = vadd.xlane.f32.xlu1 %v528_v59 }
  0xec   : > { %500 = vadd.xlane.f32.xlu0 %v499_v60 }
  0xee   : > { %503 = vadd.xlane.f32.xlu1 %v502_v62 }
  0xf0   : > { %532 = vadd.xlane.f32.xlu0 %v531_v0 }
  0xf2   : > { %535 = vadd.xlane.f32.xlu1 %v534_v1 }
 0x15d   : > { %v486_v2 = vpop.xlane.xlu0 %485 }
 0x15e   : > { %v538_v3 = vmul.f32 0.125, %v486_v2 }
 0x15f   : > { %v518_v4 = vpop.xlane.xlu1 %517 }
 0x160   : > { %v554_v5 = vmul.f32 %v538_v3, %v538_v3  ;;  %v546_v6 = vmul.f32 0.125, %v518_v4  ;;  %v578_v46 = vsub.f32 %v873_v20, %v538_v3  ;;  %v959_v20 = vld [vmem:[%s1016_s3] ss:$0 sm:$0xff] }
 0x161   : > { %v483_v7 = vpop.xlane.xlu0 %482 }
 0x162   : > { %v562_v8 = vsub.f32 %v546_v6, %v554_v5  ;;  %v929_v9 = vmul.f32 0.125, %v483_v7 }
 0x163   : > { %v492_v10 = vpop.xlane.xlu1 %491 }
 0x164   : > { %v570_v11 = vmax.f32 %v562_v8, 0.0  ;;  %v553_v14 = vmul.f32 %v929_v9, %v929_v9  ;;  %v933_v17 = vmul.f32 0.125, %v492_v10  ;;  %v577_v1 = vsub.f32 %v875_v23, %v929_v9 }
 0x165   : > { %v515_v12 = vpop.xlane.xlu0 %514 }
 0x166   : > { %v586_v13 = vadd.f32 1e-05, %v570_v11  ;;  %v545_v15 = vmul.f32 0.125, %v515_v12  ;;  %v556_v27 = vmul.f32 %v933_v17, %v933_v17 }
 0x167   : > { %v489_v16 = vpop.xlane.xlu1 %488 }
 0x168   : > { %788 = vrsqrt.f32 %v586_v13  ;;  %v561_v18 = vsub.f32 %v545_v15, %v553_v14  ;;  %v935_v19 = vmul.f32 0.125, %v489_v16 }
 0x169   : > { %v521_v21 = vpop.xlane.xlu0 %520 }
 0x16a   : > { %v569_v22 = vmax.f32 %v561_v18, 0.0  ;;  %v555_v24 = vmul.f32 %v935_v19, %v935_v19  ;;  %v547_v25 = vmul.f32 0.125, %v521_v21  ;;  %v579_v9 = vsub.f32 %v884_v32, %v935_v19 }
 0x16b   : > { %v524_v26 = vpop.xlane.xlu1 %523  ;;  %v580_v21 = vsub.f32 %v881_v28, %v933_v17 }
 0x16c   : > { %v585_v29 = vadd.f32 1e-05, %v569_v22  ;;  %v563_v30 = vsub.f32 %v547_v25, %v555_v24  ;;  %v548_v31 = vmul.f32 0.125, %v524_v26 }
 0x16d   : > { %v495_v33 = vpop.xlane.xlu0 %494 }
 0x16e   : > { %790 = vrsqrt.f32 %v585_v29  ;;  %v571_v34 = vmax.f32 %v563_v30, 0.0  ;;  %v564_v35 = vsub.f32 %v548_v31, %v556_v27  ;;  %v941_v36 = vmul.f32 0.125, %v495_v33 }
 0x16f   : > { %v498_v37 = vpop.xlane.xlu1 %497 }
 0x170   : > { %v587_v38 = vadd.f32 1e-05, %v571_v34  ;;  %v572_v39 = vmax.f32 %v564_v35, 0.0  ;;  %v943_v40 = vmul.f32 0.125, %v498_v37  ;;  %v557_v44 = vmul.f32 %v941_v36, %v941_v36 }
 0x171   : > { %v527_v41 = vpop.xlane.xlu0 %526  ;;  %v581_v17 = vsub.f32 %v897_v43, %v941_v36 }
 0x172   : > { %792 = vrsqrt.f32 %v587_v38  ;;  %v588_v42 = vadd.f32 1e-05, %v572_v39  ;;  %v549_v45 = vmul.f32 0.125, %v527_v41  ;;  %v558_v49 = vmul.f32 %v943_v40, %v943_v40 }
 0x173   : > { %v530_v47 = vpop.xlane.xlu1 %529  ;;  %v582_v34 = vsub.f32 %v902_v48, %v943_v40 }
 0x174   : > { %794 = vrsqrt.f32 %v588_v42  ;;  %v565_v50 = vsub.f32 %v549_v45, %v557_v44  ;;  %v550_v51 = vmul.f32 0.125, %v530_v47 }
 0x175   : > { %v789_v52 = vpop.eup %788  ;;  %v501_v54 = vpop.xlane.xlu0 %500 }
 0x176   : > { %v602_v56 = vmul.f32 %v789_v52, %v578_v46  ;;  %v573_v57 = vmax.f32 %v565_v50, 0.0  ;;  %v566_v59 = vsub.f32 %v550_v51, %v558_v49  ;;  %v543_v60 = vmul.f32 0.125, %v501_v54 }
 0x177   : > { %v504_v61 = vpop.xlane.xlu1 %503 }
 0x178   : > { %v617_v62 = vmul.f32 %v953_v53, %v602_v56  ;;  %v589_v63 = vadd.f32 1e-05, %v573_v57  ;;  %v574_v0 = vmax.f32 %v566_v59, 0.0  ;;  %v559_v2 = vmul.f32 %v543_v60, %v543_v60 }
 0x179   : > { %v544_v3 = vmul.f32 0.125, %v504_v61  ;;  %v533_v4 = vpop.xlane.xlu0 %532  ;;  %v583_v36 = vsub.f32 %v911_v55, %v543_v60 }
 0x17a   : > { %v632_v5 = vadd.f32 %v959_v20, %v617_v62  ;;  %796 = vrsqrt.f32 %v589_v63  ;;  %v590_v6 = vadd.f32 1e-05, %v574_v0  ;;  %v551_v7 = vmul.f32 0.125, %v533_v4 }
 0x17b   : > { %v791_v8 = vpop.eup %790  ;;  %v560_v10 = vmul.f32 %v544_v3, %v544_v3  ;;  %v536_v11 = vpop.xlane.xlu1 %535  ;;  %v584_v48 = vsub.f32 %v916_v58, %v544_v3 }
 0x17c   : > { %640 = vst.msk [vmem:[%s965_s7 + $0x8] sm:$0xff] %vm222_vm0, %v632_v5  ;;  %v601_v12 = vmul.f32 %v791_v8, %v577_v1  ;;  %798 = vrsqrt.f32 %v590_v6  ;;  %v567_v13 = vsub.f32 %v551_v7, %v559_v2  ;;  %v552_v14 = vmul.f32 0.125, %v536_v11 }
 0x17e   : > { %v616_v23 = vmul.f32 %v953_v53, %v601_v12  ;;  %v575_v15 = vmax.f32 %v567_v13, 0.0  ;;  %v568_v16 = vsub.f32 %v552_v14, %v560_v10 }
 0x17f   : > { %v793_v18 = vpop.eup %792 }
 0x180   : > { %v631_v22 = vadd.f32 %v959_v20, %v616_v23  ;;  %v603_v24 = vmul.f32 %v793_v18, %v579_v9  ;;  %v591_v25 = vadd.f32 1e-05, %v575_v15  ;;  %v576_v26 = vmax.f32 %v568_v16, 0.0 }
 0x181   : > { %v795_v27 = vpop.eup %794 }
 0x182   : > { %639 = vst.msk [vmem:[%s965_s7] sm:$0xff] %vm222_vm0, %v631_v22  ;;  %v618_v29 = vmul.f32 %v953_v53, %v603_v24  ;;  %v604_v30 = vmul.f32 %v795_v27, %v580_v21  ;;  %800 = vrsqrt.f32 %v591_v25  ;;  %v592_v32 = vadd.f32 1e-05, %v576_v26 }
 0x184   : > { %v633_v19 = vadd.f32 %v959_v20, %v618_v29  ;;  %v619_v31 = vmul.f32 %v953_v53, %v604_v30  ;;  %802 = vrsqrt.f32 %v592_v32 }
 0x186   : > { %641 = vst.msk [vmem:[%s965_s7 + $0x10] sm:$0xff] %vm222_vm0, %v633_v19  ;;  %v634_v28 = vadd.f32 %v959_v20, %v619_v31 }
 0x187   : > { %v797_v33 = vpop.eup %796 }
 0x188   : > { %642 = vst.msk [vmem:[%s965_s7 + $0x18] sm:$0xff] %vm222_vm0, %v634_v28  ;;  %v605_v35 = vmul.f32 %v797_v33, %v581_v17 }
 0x189   : > { %v799_v37 = vpop.eup %798 }
 0x18a   : > { %v620_v38 = vmul.f32 %v953_v53, %v605_v35  ;;  %v606_v39 = vmul.f32 %v799_v37, %v582_v34 }
 0x18c   : > { %v635_v41 = vadd.f32 %v959_v20, %v620_v38  ;;  %v621_v42 = vmul.f32 %v953_v53, %v606_v39 }
 0x18e   : > { %643 = vst.msk [vmem:[%s965_s7 + $0x20] sm:$0xff] %vm222_vm0, %v635_v41  ;;  %v636_v43 = vadd.f32 %v959_v20, %v621_v42 }
 0x18f   : > { %v801_v44 = vpop.eup %800 }
 0x190   : > { %644 = vst.msk [vmem:[%s965_s7 + $0x28] sm:$0xff] %vm222_vm0, %v636_v43  ;;  %v607_v40 = vmul.f32 %v801_v44, %v583_v36 }
 0x191   : > { %v803_v45 = vpop.eup %802 }
 0x192   : > { %v622_v46 = vmul.f32 %v953_v53, %v607_v40  ;;  %v608_v47 = vmul.f32 %v803_v45, %v584_v48 }
 0x194   : > { %v637_v49 = vadd.f32 %v959_v20, %v622_v46  ;;  %v623_v50 = vmul.f32 %v953_v53, %v608_v47 }
 0x196   : > { %645 = vst.msk [vmem:[%s965_s7 + $0x30] sm:$0xff] %vm222_vm0, %v637_v49  ;;  %v638_v51 = vadd.f32 %v959_v20, %v623_v50 }
 0x198   : > { %646 = vst.msk [vmem:[%s965_s7 + $0x38] sm:$0xff] %vm222_vm0, %v638_v51 }
 0x199 PF: > { %s14_s15 = sadd.s32 1, %s810_s15  }
 0x19a   : > { %p11_p4 = scmp.ge.s32.totalorder %s14_s15, 4  }
 0x19c   :  { %13 = sbr.rel (!%p11_p4) target bundleno = 1 (0x1), region = 66 }

// kernel: tpu_custom_call.1
= control target key start
LH: loop header
LB: loop body
LE: loop exit
PB: predicated region body
PF: predicated region fallthrough
CT: control target
= control target key end

     0   :  { %s837_s15 = smov 0   ;;  %s1013_s0 = inlined_call_operand.vmem [shape: f32[16,2,8,8], index: 0, kind: input, shape index: {}]   ;;  %s1014_s1 = inlined_call_operand.vmem [shape: f32[16,8], index: 1, kind: input, shape index: {}]   ;;  %s1015_s2 = inlined_call_operand.vmem [shape: f32[1,8], index: 2, kind: input, shape index: {}]   ;;  %s1016_s3 = inlined_call_operand.vmem [shape: f32[1,8], index: 3, kind: input, shape index: {}]   ;;  %s1017_s4 = inlined_call_operand.vmem [shape: f32[128,8], index: 4, kind: output, shape index: {}]  }
   0x1 LB: > { %s703_s16 = sadd.s32 4294967295, %s810_s15   ;;  %p707_p0 = scmp.ge.s32.totalorder %s810_s15, 1  ;;  %s810_s15 = sphi %s837_s15, %s14_s15  }
   0x2   : > { %p164_p1 = scmp.lt.s32.totalorder %s810_s15, 3 }
   0x4   : > { %p165_p2 = pnand %p707_p0, %p164_p1 }
   0x5   : > { %s708_s21 = sshll.u32 (!%p165_p2), %s703_s16, 3 }
   0x6   : > { %168 = sbr.rel (%p165_p2) target bundleno = 409 (0x199), region = 36  ;;  %p192_p3 = scmp.lt.s32.totalorder (!%p165_p2), %s708_s21, 15 }
   0xb   : > { %v221_v0 = vld [vmem:[%s1014_s1 + $0x8] sm:$0xff]  ;;  %v220_v1 = vld [vmem:[%s1014_s1] sm:$0xff]  ;;  %s1019_s21 = smov (!%p192_p3, %s708_s21), 15  ;;  %vm222_vm0 = vcmask 64512  }
   0xc   : > { %752 = vmatprep.subr.mxu0 %v221_v0  ;;  %766 = vmatprep.subr.mxu1 %v220_v1  ;;  %s733_s22 = sshll.u32 %s1019_s21, 4  ;;  %s712_s28 = sshll.u32 %s1019_s21, 3 }
   0xd   : > { %753 = vmatpush3.msra.mxu0 %v221_v0  ;;  %767 = vmatpush3.msra.mxu1 %v220_v1  ;;  %s196_s25 = scalar_lea.vmem %s1013_s0, %s733_s22  ;;  %s965_s7 = scalar_lea.vmem %s1017_s4, %s712_s28 }
   0xe   : > { %v205_v2 = vld [vmem:[%s196_s25 + $0x8] sm:$0xff]  ;;  %v204_v3 = vld [vmem:[%s196_s25] sm:$0xff]  ;;  %v207_v4 = vld [vmem:[%s196_s25 + $0x18] sm:$0xff] }
   0xf   : > { %754 = vmatprep.mubr.msk.f32.mxu0 %vm222_vm0, %v205_v2  ;;  %768 = vmatprep.mubr.msk.f32.mxu1 %vm222_vm0, %v204_v3  ;;  %v206_v5 = vld [vmem:[%s196_s25 + $0x10] sm:$0xff]  ;;  %v209_v6 = vld [vmem:[%s196_s25 + $0x28] sm:$0xff]  ;;  %v208_v7 = vld [vmem:[%s196_s25 + $0x20] sm:$0xff] }
  0x10   : > { %755 = vmatmul.mubr.msk.f32.vlgmr.msra.gmra.mxu0 %vm222_vm0, %v207_v4  ;;  %769 = vmatmul.mubr.msk.f32.vlgmr.msra.gmra.mxu1 %vm222_vm0, %v206_v5  ;;  %v211_v8 = vld [vmem:[%s196_s25 + $0x38] sm:$0xff]  ;;  %v210_v9 = vld [vmem:[%s196_s25 + $0x30] sm:$0xff]  ;;  %v213_v10 = vld [vmem:[%s196_s25 + $0x48] sm:$0xff] }
  0x11   : > { %757 = vmatprep.mubr.msk.f32.mxu0 %vm222_vm0, %v209_v6  ;;  %771 = vmatprep.mubr.msk.f32.mxu1 %vm222_vm0, %v208_v7  ;;  %v212_v11 = vld [vmem:[%s196_s25 + $0x40] sm:$0xff]  ;;  %v215_v12 = vld [vmem:[%s196_s25 + $0x58] sm:$0xff]  ;;  %v214_v13 = vld [vmem:[%s196_s25 + $0x50] sm:$0xff] }
  0x12   : > { %v217_v14 = vld [vmem:[%s196_s25 + $0x68] sm:$0xff]  ;;  %v216_v15 = vld [vmem:[%s196_s25 + $0x60] sm:$0xff]  ;;  %v219_v16 = vld [vmem:[%s196_s25 + $0x78] sm:$0xff] }
  0x13   : > { %v218_v17 = vld [vmem:[%s196_s25 + $0x70] sm:$0xff] }
  0x14   : > { %758 = vmatmul.mubr.msk.f32.gmra.mxu0 %vm222_vm0, %v211_v8  ;;  %772 = vmatmul.mubr.msk.f32.gmra.mxu1 %vm222_vm0, %v210_v9 }
  0x15   : > { %760 = vmatprep.mubr.msk.f32.mxu0 %vm222_vm0, %v213_v10  ;;  %774 = vmatprep.mubr.msk.f32.mxu1 %vm222_vm0, %v212_v11 }
  0x18   : > { %761 = vmatmul.mubr.msk.f32.gmra.mxu0 %vm222_vm0, %v215_v12  ;;  %775 = vmatmul.mubr.msk.f32.gmra.mxu1 %vm222_vm0, %v214_v13 }
  0x19   : > { %763 = vmatprep.mubr.msk.f32.mxu0 %vm222_vm0, %v217_v14  ;;  %777 = vmatprep.mubr.msk.f32.mxu1 %vm222_vm0, %v216_v15 }
  0x1c   : > { %764 = vmatmul.mubr.msk.f32.gmra.mxu0 %vm222_vm0, %v219_v16  ;;  %778 = vmatmul.mubr.msk.f32.gmra.mxu1 %vm222_vm0, %v218_v17 }
  0xd0   : > { %v756_v18 = vpop.f32.mrf.mxu0  ;;  %v770_v19 = vpop.f32.mrf.mxu1 }
  0xd1   : > { %v873_v20 = vadd.f32 %v770_v19, %v756_v18 }
  0xd2   : > { %v313_v21 = vpop.f32.mrf.mxu0  ;;  %v442_v22 = vpop.f32.mrf.mxu1 }
  0xd3   : > { %v875_v23 = vadd.f32 %v442_v22, %v313_v21  ;;  %v484_v24 = vsel %vm222_vm0, %v873_v20, 0.0  ;;  %v506_v25 = vmul.f32 %v873_v20, %v873_v20 }
  0xd4   : > { %v759_v26 = vpop.f32.mrf.mxu0  ;;  %485 = vadd.xlane.f32.xlu0 %v484_v24  ;;  %v773_v27 = vpop.f32.mrf.mxu1 }
  0xd5   : > { %v881_v28 = vadd.f32 %v773_v27, %v759_v26  ;;  %v516_v29 = vsel %vm222_vm0, %v506_v25, 0.0  ;;  %v481_v33 = vsel %vm222_vm0, %v875_v23, 0.0  ;;  %v505_v35 = vmul.f32 %v875_v23, %v875_v23 }
  0xd6   : > { %v323_v30 = vpop.f32.mrf.mxu0  ;;  %517 = vadd.xlane.f32.xlu1 %v516_v29  ;;  %v452_v31 = vpop.f32.mrf.mxu1 }
  0xd7   : > { %v884_v32 = vadd.f32 %v452_v31, %v323_v30  ;;  %v490_v34 = vsel %vm222_vm0, %v881_v28, 0.0  ;;  %v513_v40 = vsel %vm222_vm0, %v505_v35, 0.0  ;;  %v508_v44 = vmul.f32 %v881_v28, %v881_v28 }
  0xd8   : > { %482 = vadd.xlane.f32.xlu0 %v481_v33  ;;  %v762_v36 = vpop.f32.mrf.mxu0  ;;  %v776_v37 = vpop.f32.mrf.mxu1 }
  0xd9   : > { %v507_v41 = vmul.f32 %v884_v32, %v884_v32  ;;  %v487_v42 = vsel %vm222_vm0, %v884_v32, 0.0  ;;  %v902_v48 = vadd.f32 %v776_v37, %v762_v36  ;;  %v522_v49 = vsel %vm222_vm0, %v508_v44, 0.0 }
  0xda   : > { %491 = vadd.xlane.f32.xlu1 %v490_v34  ;;  %v333_v38 = vpop.f32.mrf.mxu0  ;;  %v462_v39 = vpop.f32.mrf.mxu1 }
  0xdb   : > { %v897_v43 = vadd.f32 %v462_v39, %v333_v38  ;;  %v519_v47 = vsel %vm222_vm0, %v507_v41, 0.0  ;;  %v496_v54 = vsel %vm222_vm0, %v902_v48, 0.0  ;;  %v510_v56 = vmul.f32 %v902_v48, %v902_v48 }
  0xdc   : > { %514 = vadd.xlane.f32.xlu0 %v513_v40  ;;  %v765_v45 = vpop.f32.mrf.mxu0  ;;  %v779_v46 = vpop.f32.mrf.mxu1 }
  0xdd   : > { %v493_v50 = vsel %vm222_vm0, %v897_v43, 0.0  ;;  %v509_v53 = vmul.f32 %v897_v43, %v897_v43  ;;  %v916_v58 = vadd.f32 %v779_v46, %v765_v45  ;;  %v528_v59 = vsel %vm222_vm0, %v510_v56, 0.0 }
  0xde   : > { %488 = vadd.xlane.f32.xlu1 %v487_v42  ;;  %v343_v51 = vpop.f32.mrf.mxu0  ;;  %v472_v52 = vpop.f32.mrf.mxu1 }
  0xdf   : > { %v911_v55 = vadd.f32 %v472_v52, %v343_v51  ;;  %v525_v57 = vsel %vm222_vm0, %v509_v53, 0.0  ;;  %v502_v62 = vsel %vm222_vm0, %v916_v58, 0.0  ;;  %v512_v63 = vmul.f32 %v916_v58, %v916_v58  ;;  %v953_v53 = vld [vmem:[%s1015_s2] ss:$0 sm:$0xff] }
  0xe0   : > { %520 = vadd.xlane.f32.xlu0 %v519_v47 }
  0xe1   : > { %v499_v60 = vsel %vm222_vm0, %v911_v55, 0.0  ;;  %v511_v61 = vmul.f32 %v911_v55, %v911_v55  ;;  %v534_v1 = vsel %vm222_vm0, %v512_v63, 0.0 }
  0xe2   : > { %523 = vadd.xlane.f32.xlu1 %v522_v49 }
  0xe3   : > { %v531_v0 = vsel %vm222_vm0, %v511_v61, 0.0 }
  0xe4   : > { %494 = vadd.xlane.f32.xlu0 %v493_v50 }
  0xe6   : > { %497 = vadd.xlane.f32.xlu1 %v496_v54 }
  0xe8   : > { %526 = vadd.xlane.f32.xlu0 %v525_v57 }
  0xea   : > { %529 = vadd.xlane.f32.xlu1 %v528_v59 }
  0xec   : > { %500 = vadd.xlane.f32.xlu0 %v499_v60 }
  0xee   : > { %503 = vadd.xlane.f32.xlu1 %v502_v62 }
  0xf0   : > { %532 = vadd.xlane.f32.xlu0 %v531_v0 }
  0xf2   : > { %535 = vadd.xlane.f32.xlu1 %v534_v1 }
 0x15d   : > { %v486_v2 = vpop.xlane.xlu0 %485 }
 0x15e   : > { %v538_v3 = vmul.f32 0.125, %v486_v2 }
 0x15f   : > { %v518_v4 = vpop.xlane.xlu1 %517 }
 0x160   : > { %v554_v5 = vmul.f32 %v538_v3, %v538_v3  ;;  %v546_v6 = vmul.f32 0.125, %v518_v4  ;;  %v578_v46 = vsub.f32 %v873_v20, %v538_v3  ;;  %v959_v20 = vld [vmem:[%s1016_s3] ss:$0 sm:$0xff] }
 0x161   : > { %v483_v7 = vpop.xlane.xlu0 %482 }
 0x162   : > { %v562_v8 = vsub.f32 %v546_v6, %v554_v5  ;;  %v929_v9 = vmul.f32 0.125, %v483_v7 }
 0x163   : > { %v492_v10 = vpop.xlane.xlu1 %491 }
 0x164   : > { %v570_v11 = vmax.f32 %v562_v8, 0.0  ;;  %v553_v14 = vmul.f32 %v929_v9, %v929_v9  ;;  %v933_v17 = vmul.f32 0.125, %v492_v10  ;;  %v577_v1 = vsub.f32 %v875_v23, %v929_v9 }
 0x165   : > { %v515_v12 = vpop.xlane.xlu0 %514 }
 0x166   : > { %v586_v13 = vadd.f32 1e-05, %v570_v11  ;;  %v545_v15 = vmul.f32 0.125, %v515_v12  ;;  %v556_v27 = vmul.f32 %v933_v17, %v933_v17 }
 0x167   : > { %v489_v16 = vpop.xlane.xlu1 %488 }
 0x168   : > { %788 = vrsqrt.f32 %v586_v13  ;;  %v561_v18 = vsub.f32 %v545_v15, %v553_v14  ;;  %v935_v19 = vmul.f32 0.125, %v489_v16 }
 0x169   : > { %v521_v21 = vpop.xlane.xlu0 %520 }
 0x16a   : > { %v569_v22 = vmax.f32 %v561_v18, 0.0  ;;  %v555_v24 = vmul.f32 %v935_v19, %v935_v19  ;;  %v547_v25 = vmul.f32 0.125, %v521_v21  ;;  %v579_v9 = vsub.f32 %v884_v32, %v935_v19 }
 0x16b   : > { %v524_v26 = vpop.xlane.xlu1 %523  ;;  %v580_v21 = vsub.f32 %v881_v28, %v933_v17 }
 0x16c   : > { %v585_v29 = vadd.f32 1e-05, %v569_v22  ;;  %v563_v30 = vsub.f32 %v547_v25, %v555_v24  ;;  %v548_v31 = vmul.f32 0.125, %v524_v26 }
 0x16d   : > { %v495_v33 = vpop.xlane.xlu0 %494 }
 0x16e   : > { %790 = vrsqrt.f32 %v585_v29  ;;  %v571_v34 = vmax.f32 %v563_v30, 0.0  ;;  %v564_v35 = vsub.f32 %v548_v31, %v556_v27  ;;  %v941_v36 = vmul.f32 0.125, %v495_v33 }
 0x16f   : > { %v498_v37 = vpop.xlane.xlu1 %497 }
 0x170   : > { %v587_v38 = vadd.f32 1e-05, %v571_v34  ;;  %v572_v39 = vmax.f32 %v564_v35, 0.0  ;;  %v943_v40 = vmul.f32 0.125, %v498_v37  ;;  %v557_v44 = vmul.f32 %v941_v36, %v941_v36 }
 0x171   : > { %v527_v41 = vpop.xlane.xlu0 %526  ;;  %v581_v17 = vsub.f32 %v897_v43, %v941_v36 }
 0x172   : > { %792 = vrsqrt.f32 %v587_v38  ;;  %v588_v42 = vadd.f32 1e-05, %v572_v39  ;;  %v549_v45 = vmul.f32 0.125, %v527_v41  ;;  %v558_v49 = vmul.f32 %v943_v40, %v943_v40 }
 0x173   : > { %v530_v47 = vpop.xlane.xlu1 %529  ;;  %v582_v34 = vsub.f32 %v902_v48, %v943_v40 }
 0x174   : > { %794 = vrsqrt.f32 %v588_v42  ;;  %v565_v50 = vsub.f32 %v549_v45, %v557_v44  ;;  %v550_v51 = vmul.f32 0.125, %v530_v47 }
 0x175   : > { %v789_v52 = vpop.eup %788  ;;  %v501_v54 = vpop.xlane.xlu0 %500 }
 0x176   : > { %v602_v56 = vmul.f32 %v789_v52, %v578_v46  ;;  %v573_v57 = vmax.f32 %v565_v50, 0.0  ;;  %v566_v59 = vsub.f32 %v550_v51, %v558_v49  ;;  %v543_v60 = vmul.f32 0.125, %v501_v54 }
 0x177   : > { %v504_v61 = vpop.xlane.xlu1 %503 }
 0x178   : > { %v617_v62 = vmul.f32 %v953_v53, %v602_v56  ;;  %v589_v63 = vadd.f32 1e-05, %v573_v57  ;;  %v574_v0 = vmax.f32 %v566_v59, 0.0  ;;  %v559_v2 = vmul.f32 %v543_v60, %v543_v60 }
 0x179   : > { %v544_v3 = vmul.f32 0.125, %v504_v61  ;;  %v533_v4 = vpop.xlane.xlu0 %532  ;;  %v583_v36 = vsub.f32 %v911_v55, %v543_v60 }
 0x17a   : > { %v632_v5 = vadd.f32 %v959_v20, %v617_v62  ;;  %796 = vrsqrt.f32 %v589_v63  ;;  %v590_v6 = vadd.f32 1e-05, %v574_v0  ;;  %v551_v7 = vmul.f32 0.125, %v533_v4 }
 0x17b   : > { %v791_v8 = vpop.eup %790  ;;  %v560_v10 = vmul.f32 %v544_v3, %v544_v3  ;;  %v536_v11 = vpop.xlane.xlu1 %535  ;;  %v584_v48 = vsub.f32 %v916_v58, %v544_v3 }
 0x17c   : > { %640 = vst.msk [vmem:[%s965_s7 + $0x8] sm:$0xff] %vm222_vm0, %v632_v5  ;;  %v601_v12 = vmul.f32 %v791_v8, %v577_v1  ;;  %798 = vrsqrt.f32 %v590_v6  ;;  %v567_v13 = vsub.f32 %v551_v7, %v559_v2  ;;  %v552_v14 = vmul.f32 0.125, %v536_v11 }
 0x17e   : > { %v616_v23 = vmul.f32 %v953_v53, %v601_v12  ;;  %v575_v15 = vmax.f32 %v567_v13, 0.0  ;;  %v568_v16 = vsub.f32 %v552_v14, %v560_v10 }
 0x17f   : > { %v793_v18 = vpop.eup %792 }
 0x180   : > { %v631_v22 = vadd.f32 %v959_v20, %v616_v23  ;;  %v603_v24 = vmul.f32 %v793_v18, %v579_v9  ;;  %v591_v25 = vadd.f32 1e-05, %v575_v15  ;;  %v576_v26 = vmax.f32 %v568_v16, 0.0 }
 0x181   : > { %v795_v27 = vpop.eup %794 }
 0x182   : > { %639 = vst.msk [vmem:[%s965_s7] sm:$0xff] %vm222_vm0, %v631_v22  ;;  %v618_v29 = vmul.f32 %v953_v53, %v603_v24  ;;  %v604_v30 = vmul.f32 %v795_v27, %v580_v21  ;;  %800 = vrsqrt.f32 %v591_v25  ;;  %v592_v32 = vadd.f32 1e-05, %v576_v26 }
 0x184   : > { %v633_v19 = vadd.f32 %v959_v20, %v618_v29  ;;  %v619_v31 = vmul.f32 %v953_v53, %v604_v30  ;;  %802 = vrsqrt.f32 %v592_v32 }
 0x186   : > { %641 = vst.msk [vmem:[%s965_s7 + $0x10] sm:$0xff] %vm222_vm0, %v633_v19  ;;  %v634_v28 = vadd.f32 %v959_v20, %v619_v31 }
 0x187   : > { %v797_v33 = vpop.eup %796 }
 0x188   : > { %642 = vst.msk [vmem:[%s965_s7 + $0x18] sm:$0xff] %vm222_vm0, %v634_v28  ;;  %v605_v35 = vmul.f32 %v797_v33, %v581_v17 }
 0x189   : > { %v799_v37 = vpop.eup %798 }
 0x18a   : > { %v620_v38 = vmul.f32 %v953_v53, %v605_v35  ;;  %v606_v39 = vmul.f32 %v799_v37, %v582_v34 }
 0x18c   : > { %v635_v41 = vadd.f32 %v959_v20, %v620_v38  ;;  %v621_v42 = vmul.f32 %v953_v53, %v606_v39 }
 0x18e   : > { %643 = vst.msk [vmem:[%s965_s7 + $0x20] sm:$0xff] %vm222_vm0, %v635_v41  ;;  %v636_v43 = vadd.f32 %v959_v20, %v621_v42 }
 0x18f   : > { %v801_v44 = vpop.eup %800 }
 0x190   : > { %644 = vst.msk [vmem:[%s965_s7 + $0x28] sm:$0xff] %vm222_vm0, %v636_v43  ;;  %v607_v40 = vmul.f32 %v801_v44, %v583_v36 }
 0x191   : > { %v803_v45 = vpop.eup %802 }
 0x192   : > { %v622_v46 = vmul.f32 %v953_v53, %v607_v40  ;;  %v608_v47 = vmul.f32 %v803_v45, %v584_v48 }
 0x194   : > { %v637_v49 = vadd.f32 %v959_v20, %v622_v46  ;;  %v623_v50 = vmul.f32 %v953_v53, %v608_v47 }
 0x196   : > { %645 = vst.msk [vmem:[%s965_s7 + $0x30] sm:$0xff] %vm222_vm0, %v637_v49  ;;  %v638_v51 = vadd.f32 %v959_v20, %v623_v50 }
 0x198   : > { %646 = vst.msk [vmem:[%s965_s7 + $0x38] sm:$0xff] %vm222_vm0, %v638_v51 }
 0x199 PF: > { %s14_s15 = sadd.s32 1, %s810_s15  }
 0x19a   : > { %p11_p4 = scmp.ge.s32.totalorder %s14_s15, 4  }
 0x19c   :  { %13 = sbr.rel (!%p11_p4) target bundleno = 1 (0x1), region = 66 }

</bundles_post_ra>
